<compile_context>
chip_gen: v6e
topology: v6e:2x2x1
jax: 0.10.0
libtpu: 0.0.40
codegen_flags: <defaults>
</compile_context>

<pallas_src>
import itertools

import jax
import jax.numpy as jnp
from jax.experimental import pallas as pl
from jax.experimental.pallas import tpu as pltpu


def _round_up(x, m):
    return ((x + m - 1) // m) * m


def _cdiv(a, b):
    return -(-a // b)


# ----------------------------------------------------------------------------
# Kernel
# ----------------------------------------------------------------------------
def _antecedent_kernel(x_ref, sel_ref, o_ref):
    """x_ref: (TB, feat) f32, sel_ref: (n_in, feat, TN) f32, o_ref: (TB, TN)."""
    x = x_ref[...]                                           # (TB, feat)
    n_in = sel_ref.shape[0]
    # n_in is tiny and static -> unrolled loop; each step is one small MXU
    # matmul that performs the one-hot gather for variable i, fused with a
    # VPU multiply into the f32 accumulator (initialised from i = 0).
    acc = jnp.dot(x, sel_ref[0], preferred_element_type=jnp.float32)
    for i in range(1, n_in):
        acc = acc * jnp.dot(x, sel_ref[i], preferred_element_type=jnp.float32)
    o_ref[...] = acc.astype(o_ref.dtype)


# ----------------------------------------------------------------------------
# One-time precompute (hoisted out of the forward path)
# ----------------------------------------------------------------------------
def make_mf_indices(mf_count):
    """Deterministic rule index table, identical to the PyTorch __init__."""
    idx = list(itertools.product(*[range(n) for n in mf_count]))
    return jnp.asarray(idx, dtype=jnp.int32)                 # (n_rules, n_in)


def build_selector(mf_indices, n_in, n_mfs, dtype=jnp.float32):
    """One-hot selector, precomputed once per mf_indices.

    Shape (n_in, feat, n_rules) with feat = n_in * n_mfs; slab i is nonzero
    only in rows [i*n_mfs, (i+1)*n_mfs), so the kernel can matmul the full
    (TB, feat) x tile against sel[i] without unaligned lane slices.
    """
    mf_indices = jnp.asarray(mf_indices, dtype=jnp.int32)
    n_rules = mf_indices.shape[0]
    assert mf_indices.shape[1] == n_in
    # Out-of-range indices would silently produce a 0 fire-strength.
    assert int(jnp.max(mf_indices)) < n_mfs, "mf_indices entry >= n_mfs"
    feat = n_in * n_mfs
    oh = jax.nn.one_hot(mf_indices, n_mfs, dtype=dtype)      # (n_rules, n_in, n_mfs)
    slabs = []
    for i in range(n_in):
        col = oh[:, i, :].T                                  # (n_mfs, n_rules)
        col = jnp.pad(col, ((i * n_mfs, feat - (i + 1) * n_mfs), (0, 0)))
        slabs.append(col)
    return jnp.stack(slabs, axis=0)                          # (n_in, feat, n_rules)


# ----------------------------------------------------------------------------
# Tiling / forward
# ----------------------------------------------------------------------------
def _choose_tiles(n_cases, n_rules, feat, n_in, vmem_budget_bytes):
    # Rule tile: single full-dim block when small (unpadded -> masked stores
    # but half the HBM bytes vs zero-padding to 128); 2048-lane tiles for big
    # rule spaces so VMEM stays bounded and the rule axis adds parallel work.
    tn = n_rules if n_rules <= 2048 else 2048
    nr = _cdiv(n_rules, tn)

    # Per-step VMEM footprint: double-buffered x & out blocks, ~2 f32 temps
    # (acc + matmul result), double-buffered resident selector block.
    sel_bytes = 2 * n_in * feat * tn * 4
    bytes_per_row = 4 * (2 * feat + 4 * tn)
    tb = (vmem_budget_bytes - sel_bytes) // max(bytes_per_row, 1)
    tb = max(8, min(1024, (tb // 8) * 8))
    tb = min(tb, _round_up(n_cases, 8))
    nb = _cdiv(n_cases, tb)

    # Guarantee >= 2 parallel grid steps when possible (v7x megacore).
    if nb * nr < 2 and n_cases > 8:
        tb = _round_up(_cdiv(n_cases, 2), 8)
        nb = _cdiv(n_cases, tb)
    return tb, tn, nb, nr


def antecedent_forward(x, sel, *, vmem_budget_bytes=40 * 1024 * 1024):
    """x: (n_cases, n_in, n_mfs), sel: (n_in, n_in*n_mfs, n_rules) f32."""
    n_cases, n_in, n_mfs = x.shape
    sel_in, feat, n_rules = sel.shape
    assert sel_in == n_in and feat == n_in * n_mfs

    tb, tn, nb, nr = _choose_tiles(n_cases, n_rules, feat, n_in,
                                   vmem_budget_bytes)

    # Lane-dense 2-D x layout: batch -> sublanes, (var, mf) -> lanes.
    x2d = x.reshape(n_cases, feat)

    # NOTE: f32 jnp.dot in-kernel is relied on to be (near-)exact vs the f32
    # reference; verified by the allclose checks below on this hardware.
    return pl.pallas_call(
        _antecedent_kernel,
        out_shape=jax.ShapeDtypeStruct((n_cases, n_rules), x.dtype),
        grid=(nb, nr),
        in_specs=[
            pl.BlockSpec((tb, feat), lambda b, j: (b, 0)),
            # Selector block depends only on the rule-tile index -> stays
            # resident in VMEM across the batch axis.
            pl.BlockSpec((n_in, feat, tn), lambda b, j: (0, 0, j)),
        ],
        out_specs=pl.BlockSpec((tb, tn), lambda b, j: (b, j)),
        compiler_params=pltpu.CompilerParams(
            dimension_semantics=("parallel", "parallel"),
            vmem_limit_bytes=48 * 1024 * 1024,
        ),
    )(x2d, sel)


# ----------------------------------------------------------------------------
# Reference + checks
# ----------------------------------------------------------------------------
def antecedent_reference(x, mf_indices):
    """Pure-JAX reference mirroring torch.gather + torch.prod."""
    ants = jnp.take_along_axis(
        jnp.transpose(x, (0, 2, 1)),                               # (B, n_mfs, n_in)
        jnp.broadcast_to(mf_indices[None, :, :],
                         (x.shape[0],) + mf_indices.shape),        # (B, n_rules, n_in)
        axis=1,
    )
    return jnp.prod(ants, axis=2)


def _check(mf_count, n_cases, key):
    n_in = len(mf_count)
    n_mfs = max(mf_count)
    mf_indices = make_mf_indices(mf_count)
    sel = build_selector(mf_indices, n_in, n_mfs)     # hoisted, one-time precompute
    x = jax.random.uniform(key, (n_cases, n_in, n_mfs), dtype=jnp.float32)
    out = jax.block_until_ready(antecedent_forward(x, sel))
    ref = antecedent_reference(x, mf_indices)
    assert out.shape == (n_cases, mf_indices.shape[0])
    assert jnp.allclose(out, ref, atol=1e-6, rtol=1e-5), "mismatch vs reference"


if __name__ == "__main__":
    key = jax.random.PRNGKey(0)
    k1, k2, k3 = jax.random.split(key, 3)

    # Small: 3 fuzzy variables x 4 MFs -> 64 rules, single grid step,
    # unpadded 64-lane output block (masked stores, minimal HBM bytes).
    _check(mf_count=[4, 4, 4], n_cases=8, key=k1)

    # Ragged batch blocks (no batch padding, no post-slice) + non-uniform
    # MF counts -> 24 rules; 2 parallel batch grid steps.
    _check(mf_count=[3, 4, 2], n_cases=300, key=k2)

    # Large rule space: 3^7 = 2187 rules -> rule-axis tiling (TN = 2048) with
    # a ragged last rule tile.
    _check(mf_count=[3] * 7, n_cases=32, key=k3)

    print("KERNEL_OK")
</pallas_src>

<mosaic_0001>
module attributes {stable_mosaic.version = 11 : i64} {
  func.func @_antecedent_kernel(%arg0: i32, %arg1: i32, %arg2: memref<8x12xf32, #tpu.memory_space<vmem>>, %arg3: memref<3x12x64xf32, #tpu.memory_space<vmem>>, %arg4: memref<8x64xf32, #tpu.memory_space<vmem>>) attributes {dimension_semantics = [#tpu.dimension_semantics<parallel>, #tpu.dimension_semantics<parallel>], iteration_bounds = array<i64: 1, 1>, scalar_prefetch = 0 : i64, scratch_operands = 0 : i64, tpu.core_type = #tpu.core_type<tc>, window_params = [{transform_indices = @transform_0, window_bounds = array<i64: 8, 12>}, {transform_indices = @transform_1, window_bounds = array<i64: 3, 12, 64>}, {transform_indices = @transform_2, window_bounds = array<i64: 8, 64>}]} {
    %c0 = arith.constant 0 : index
    %c0_0 = arith.constant 0 : index
    %0 = vector.load %arg2[%c0, %c0_0] : memref<8x12xf32, #tpu.memory_space<vmem>>, vector<8x12xf32>
    %c0_1 = arith.constant 0 : index
    %c0_2 = arith.constant 0 : index
    %c0_3 = arith.constant 0 : index
    %1 = vector.load %arg3[%c0_1, %c0_2, %c0_3] : memref<3x12x64xf32, #tpu.memory_space<vmem>>, vector<1x12x64xf32>
    %2 = vector.shape_cast %1 : vector<1x12x64xf32> to vector<12x64xf32>
    %cst = arith.constant dense<0.000000e+00> : vector<8x64xf32>
    %3 = tpu.matmul %0, %2, %cst {dimension_numbers = #tpu.dot_dimension_numbers<[1], [0], [0], [1], [0, 0, 1, 1], [], []>} : vector<8x12xf32>, vector<12x64xf32>, vector<8x64xf32> -> vector<8x64xf32>
    %c1 = arith.constant 1 : index
    %c0_4 = arith.constant 0 : index
    %c0_5 = arith.constant 0 : index
    %4 = vector.load %arg3[%c1, %c0_4, %c0_5] : memref<3x12x64xf32, #tpu.memory_space<vmem>>, vector<1x12x64xf32>
    %5 = vector.shape_cast %4 : vector<1x12x64xf32> to vector<12x64xf32>
    %cst_6 = arith.constant dense<0.000000e+00> : vector<8x64xf32>
    %6 = tpu.matmul %0, %5, %cst_6 {dimension_numbers = #tpu.dot_dimension_numbers<[1], [0], [0], [1], [0, 0, 1, 1], [], []>} : vector<8x12xf32>, vector<12x64xf32>, vector<8x64xf32> -> vector<8x64xf32>
    %7 = arith.mulf %3, %6 : vector<8x64xf32>
    %c2 = arith.constant 2 : index
    %c0_7 = arith.constant 0 : index
    %c0_8 = arith.constant 0 : index
    %8 = vector.load %arg3[%c2, %c0_7, %c0_8] : memref<3x12x64xf32, #tpu.memory_space<vmem>>, vector<1x12x64xf32>
    %9 = vector.shape_cast %8 : vector<1x12x64xf32> to vector<12x64xf32>
    %cst_9 = arith.constant dense<0.000000e+00> : vector<8x64xf32>
    %10 = tpu.matmul %0, %9, %cst_9 {dimension_numbers = #tpu.dot_dimension_numbers<[1], [0], [0], [1], [0, 0, 1, 1], [], []>} : vector<8x12xf32>, vector<12x64xf32>, vector<8x64xf32> -> vector<8x64xf32>
    %11 = arith.mulf %7, %10 : vector<8x64xf32>
    %c0_10 = arith.constant 0 : index
    %c0_11 = arith.constant 0 : index
    %12 = vector.load %arg4[%c0_10, %c0_11] : memref<8x64xf32, #tpu.memory_space<vmem>>, vector<8x64xf32>
    tpu.vector_store %arg4[%c0_10, %c0_11], %11 {strides = array<i32>} : memref<8x64xf32, #tpu.memory_space<vmem>>, vector<8x64xf32>,
    return
  }
  func.func @transform_0(%arg0: i32, %arg1: i32) -> (i32, i32) {
    %c0_i32 = arith.constant 0 : i32
    %c0_i32_0 = arith.constant 0 : i32
    return %arg0, %c0_i32 : i32, i32
  }
  func.func @transform_1(%arg0: i32, %arg1: i32) -> (i32, i32, i32) {
    %c0_i32 = arith.constant 0 : i32
    %c0_i32_0 = arith.constant 0 : i32
    %c0_i32_1 = arith.constant 0 : i32
    return %c0_i32, %c0_i32_0, %arg1 : i32, i32, i32
  }
  func.func @transform_2(%arg0: i32, %arg1: i32) -> (i32, i32) {
    %c0_i32 = arith.constant 0 : i32
    return %arg0, %arg1 : i32, i32
  }
}

</mosaic_0001>

<bundles_post_ra>
// kernel: tpu_custom_call.1
= control target key start
LH: loop header
LB: loop body
LE: loop exit
PB: predicated region body
PF: predicated region fallthrough
CT: control target
= control target key end

     0   :  { %7 = vsyncpa [#allocation3], 0  ;;  %s437_s0 = inlined_call_operand.hbm [shape: f32[8,12], index: 0, kind: input, shape index: {}]   ;;  %s438_s1 = inlined_call_operand.hbm [shape: f32[3,12,64], index: 1, kind: input, shape index: {}]   ;;  %s439_s2 = inlined_call_operand.hbm [shape: f32[8,64], index: 2, kind: output, shape index: {}]  }
   0x1   :  { %8 = vsyncpa [#allocation6], 0 }
   0x2   :  { %9 = vsyncpa [#allocation4], 0  ;;  %s400_s9 = smov [#allocation2]   ;;  %s401_s11 = smov [#allocation5]  }
   0x3   :  { %s16_s10 = sshll.u32 %s400_s9, 4  ;;  %s25_s12 = sshll.u32 %s401_s11, 4  ;;  %s17_s10 = int_to_ptr.vmem [resolvable:$true] %s16_s10  ;;  %s26_s12 = int_to_ptr.vmem [resolvable:$true] %s25_s12 }
   0x4   :  { %s342_s13 = scalar_lea.vmem %s17_s10, 128  ;;  %p347_p1 = scmp.lt.s32.totalorder %s17_s10, %s17_s10 }
   0x5   :  { %p343_p0 = scmp.ne.s32.totalorder %s17_s10, %s342_s13  ;;  %p348_p2 = scmp.lt.s32.totalorder %s342_s13, %s342_s13 }
   0x7   :  { %p349_p3 = por %p348_p2, %p347_p1 }
   0x9   :  { %p350_p4 = pnand %p349_p3, %p343_p0 }
   0xb   :  { %353 = shalt.err (!%p350_p4)
}
   0xc   :  { %19 = dma.hbm_to_vmem [thread:$0]  %s437_s0, 128, %s17_s10, [#allocation3]  }
   0xd   :  { %s362_s16 = scalar_lea.vmem %s26_s12, 768  ;;  %p367_p6 = scmp.lt.s32.totalorder %s26_s12, %s26_s12 }
   0xe   :  { %p363_p5 = scmp.ne.s32.totalorder %s26_s12, %s362_s16  ;;  %p368_p7 = scmp.lt.s32.totalorder %s362_s16, %s362_s16 }
  0x10   :  { %p369_p8 = por %p368_p7, %p367_p6 }
  0x12   :  { %p370_p9 = pnand %p369_p8, %p363_p5 }
  0x14   :  { %373 = shalt.err (!%p370_p9)
}
  0x15   :  { %s402_s17 = smov 128   ;;  %s403_s18 = smov 8  }
  0x16   :  { %31 = dma.hbm_to_vmem [thread:$0]  %s438_s1, 768, %s26_s12, [#allocation6], %s402_s17, %s402_s17, %s403_s18  }
  0x17   :  { %394 = dma.done.wait [#allocation3], 128  }
  0x18   :  { %395 = vsyncadd [#allocation3], 4294967168 }
  0x19   :  { %396 = dma.done.wait [#allocation6], 768  }
  0x1a   :  { %397 = vsyncadd [#allocation6], 4294966528  ;;  %v404_v0 = vmov 0.0   ;;  %vm405_vm0 = vmmov 0   ;;  %vm45_vm1 = vcmask 1043456   ;;  %v39_v3 = vld [vmem:[#allocation5] sm:$0xff] }
  0x1b   :  { %306 = vmatprep.subr.mxu0 %v404_v0  ;;  %313 = vmatprep.subr.mxu1 %v404_v0  ;;  %v40_v1 = vld [vmem:[#allocation5 + $0x8] sm:$0xf]  ;;  %v121_v2 = vld [vmem:[#allocation5 + $0x18] sm:$0xf]  ;;  %vm41_vm2 = vcmask 97280   ;;  %v120_v5 = vld [vmem:[#allocation5 + $0x10] sm:$0xff] }
  0x1c   :  { %310 = vmatprep.mubr.msk.f32.mxu0 %vm405_vm0, %v404_v0  ;;  %317 = vmatprep.mubr.msk.f32.mxu1 %vm405_vm0, %v404_v0  ;;  %v38_v4 = vld [vmem:[#allocation2] sm:$0xff]  ;;  %v198_v6 = vld [vmem:[#allocation5 + $0x28] sm:$0xf]  ;;  %v197_v7 = vld [vmem:[#allocation5 + $0x20] sm:$0xff]  ;;  %s406_s0 = smov [#allocation7]   ;;  %vm273_vm3 = vcmask 523264  }
  0x1d   :  { %307 = vmatpush3.msk.msra.mxu0 %vm45_vm1, %v40_v1  ;;  %314 = vmatpush3.msk.msra.mxu1 %vm45_vm1, %v121_v2  ;;  %s281_s1 = sshll.u32 %s406_s0, 4  ;;  %s282_s1 = int_to_ptr.vmem [resolvable:$true] %s281_s1 }
  0x1e   :  { %308 = vmatprep.subr.mxu0 %v404_v0  ;;  %315 = vmatprep.subr.mxu1 %v404_v0  ;;  %s374_s21 = scalar_lea.vmem %s282_s1, 128  ;;  %p379_p11 = scmp.lt.s32.totalorder %s282_s1, %s282_s1 }
  0x1f   :  { %309 = vmatpush3.msra.mxu0 %v39_v3  ;;  %316 = vmatpush3.msra.mxu1 %v120_v5  ;;  %p375_p10 = scmp.ne.s32.totalorder %s282_s1, %s374_s21  ;;  %p380_p12 = scmp.lt.s32.totalorder %s374_s21, %s374_s21 }
  0x20   :  { %311 = vmatmul.mubr.msk.f32.vlgmr.msra.gmra.mxu0 %vm41_vm2, %v38_v4  ;;  %320 = vmatprep.subr.mxu0 %v404_v0 }
  0x21   :  { %318 = vmatmul.mubr.msk.f32.vlgmr.msra.gmra.mxu1 %vm41_vm2, %v38_v4  ;;  %321 = vmatpush3.msk.msra.mxu0 %vm45_vm1, %v198_v6  ;;  %p381_p13 = por %p380_p12, %p379_p11 }
  0x22   :  { %322 = vmatprep.subr.mxu0 %v404_v0  ;;  %324 = vmatprep.mubr.msk.f32.mxu0 %vm405_vm0, %v404_v0 }
  0x23   :  { %323 = vmatpush3.msra.mxu0 %v197_v7  ;;  %p382_p0 = pnand %p381_p13, %p375_p10 }
  0x24   :  { %325 = vmatmul.mubr.msk.f32.vlgmr.msra.gmra.mxu0 %vm41_vm2, %v38_v4 }
  0xe0   :  { %v115_v8 = vpop.f32.mrf.mxu0 }
  0xe1   :  { %v191_v9 = vpop.f32.mrf.mxu1 }
  0xe2   :  { %v312_v10 = vpop.f32.mrf.mxu0  ;;  %v195_v11 = vmul.f32 %v191_v9, %v115_v8 }
  0xe3   :  { %v319_v12 = vpop.f32.mrf.mxu1 }
  0xe4   :  { %v268_v13 = vpop.f32.mrf.mxu0 }
  0xe5   :  { %v272_v14 = vmul.f32 %v268_v13, %v195_v11 }
  0xe6   :  { %v326_v15 = vpop.f32.mrf.mxu0 }
  0xe7   :  { %274 = vst.msk [vmem:[#allocation7] sm:$0xff] %vm273_vm3, %v272_v14 }
  0xe8   :  { %385 = shalt.err (!%p382_p0)
}
  0xe9   :  { %284 = dma.vmem_to_hbm [thread:$0]  %s282_s1, 128, %s439_s2, [#allocation4]  }
  0xea   :  { %398 = dma.done.wait [#allocation4], 128  }
  0xeb   :  { %399 = vsyncadd [#allocation4], 4294967168 }
  0xec   :  { %288 = vsyncpa [#allocation3], 1 }
  0xed   :  { %289 = vsyncpa [#allocation6], 1 }
  0xee   :  { %290 = vsyncpa [#allocation4], 1 }

</bundles_post_ra>
